<compile_context>
chip_gen: v5e
topology: v5e:2x2
jax: 0.10.0
libtpu: 0.0.40
codegen_flags: <defaults>
</compile_context>

<pallas_src>
import numpy as np
import jax
import jax.numpy as jnp
from jax import lax
from jax.experimental import pallas as pl
from jax.experimental.pallas import tpu as pltpu

NEG_SLOPE = 0.01            # nl = torch.nn.LeakyReLU() default negative_slope
DILATIONS = (1, 3, 9)
EDGE = 16                   # edge rows handled by the tiny reflect fix-up matmuls (> max dilation)


def _leaky(v):
    return jnp.where(v > 0, v, NEG_SLOPE * v)


def _decblock_kernel(xq_ref, wct_ref, wres_ref, pm_ref, pp_ref, o_ref):
    # xq_ref  : (1, Tq, 2C)   f32  zero-stuffed + edge-padded (x + encoder_output), time-major
    # wct_ref : (K*2C, C)     bf16 ConvTranspose1d taps stacked along the contraction dim
    # wres_ref: (3, 3C, C)    bf16 per-unit (dilated conv ∘ pointwise conv) fused tap weights
    # pm_ref  : (3, Tout, E)  f32  0/1 reflect fix-up for the first d rows (tiny, linear in Tout)
    # pp_ref  : (3, Tout, E)  f32  0/1 reflect fix-up for the last d rows
    # o_ref   : (1, Tout, C)  f32
    Tq = xq_ref.shape[1]
    Tout, C = o_ref.shape[1], o_ref.shape[2]
    K = Tq - Tout + 1
    E = pm_ref.shape[2]

    # ---- ConvTranspose1d: K shifted views of the zero-stuffed input, one fused MXU matmul ----
    # out[t, :] = sum_s xq[t + s, :] @ W[:, :, K-1-s]
    xq = xq_ref[0]                                                            # (Tq, 2C) f32
    x_wide = jnp.concatenate([xq[s:s + Tout, :] for s in range(K)], axis=1)   # (Tout, K*2C)
    x_wide = x_wide.astype(jnp.bfloat16)
    y = jnp.dot(x_wide, wct_ref[...], preferred_element_type=jnp.float32)     # (Tout, C) f32
    y = _leaky(y)

    row = lax.broadcasted_iota(jnp.int32, (Tout, C), 0)

    # ---- 3 ResidualUnits (dilations 1, 3, 9); pointwise conv already folded into the taps ----
    for u, d in enumerate(DILATIONS):
        # Reflect-padded shifts: bulk via XLU roll, first/last d rows via tiny edge matmuls.
        fix_m = jnp.dot(pm_ref[u], y[:E, :], preferred_element_type=jnp.float32)        # (Tout, C)
        fix_p = jnp.dot(pp_ref[u], y[Tout - E:, :], preferred_element_type=jnp.float32) # (Tout, C)
        xm = jnp.where(row >= d, pltpu.roll(y, d, axis=0), fix_m)               # y[t-d], reflected
        xp = jnp.where(row < Tout - d, pltpu.roll(y, Tout - d, axis=0), fix_p)  # y[t+d], reflected
        # Fused 3-tap (+ pointwise) conv: one matmul with contraction dim 3C.
        x3 = jnp.concatenate([xm, y, xp], axis=1).astype(jnp.bfloat16)          # (Tout, 3C)
        h = jnp.dot(x3, wres_ref[u], preferred_element_type=jnp.float32)        # (Tout, C) f32
        y = y + _leaky(h)

    o_ref[0] = y.astype(o_ref.dtype)


def dec_block_forward(x_ncl, enc_ncl, w_ct, w_dil, w_pt, stride):
    """x_ncl, enc_ncl: (B, 2C, T). w_ct: (2C, C, 2S). w_dil: (3, C, C, 3). w_pt: (3, C, C, 1)."""
    B, Cin, T = x_ncl.shape
    Cin_w, C, K = w_ct.shape
    assert Cin == Cin_w and K == 2 * stride
    S, P = stride, stride // 2
    Tout = (T - 1) * S - 2 * P + K                       # PyTorch ConvTranspose1d L_out
    assert Tout >= EDGE and max(DILATIONS) < min(EDGE, Tout), \
        "reflect fix-up assumes Tout >= 16 > max dilation"

    # --- zero-stuffed / edge-padded input: ConvTranspose1d == dense conv over stuffed signal ---
    #   xq[:, j*S + (K-1-P), :] = (x + enc)[:, :, j]^T, zeros elsewhere; length Tq = Tout + K - 1.
    xs_t = jnp.transpose(x_ncl + enc_ncl, (0, 2, 1))                           # (B, T, 2C)
    Tq = Tout + K - 1
    start = K - 1 - P
    xq = jnp.zeros((B, Tq, Cin), jnp.float32)
    xq = xq.at[:, start:start + (T - 1) * S + 1:S, :].set(xs_t)

    # --- ConvTranspose taps stacked along the contraction dim (bf16 operands, f32 accumulate) ---
    wct_flat = jnp.concatenate([w_ct[:, :, K - 1 - s] for s in range(K)], axis=0)  # (K*2C, C)
    wct_flat = wct_flat.astype(jnp.bfloat16)

    # --- residual units: fold pointwise conv into the dilated taps, fuse the 3 taps -> (3C, C) ---
    wres = jnp.stack([
        jnp.concatenate([w_dil[u, :, :, t].T @ w_pt[u, :, :, 0].T for t in range(3)], axis=0)
        for u in range(len(DILATIONS))
    ]).astype(jnp.bfloat16)                                                    # (3, 3C, C)

    # --- tiny static 0/1 reflect fix-up matrices (replace the old (Tout, Tout) selects) ---
    pm = np.zeros((len(DILATIONS), Tout, EDGE), np.float32)
    pp = np.zeros((len(DILATIONS), Tout, EDGE), np.float32)
    for u, d in enumerate(DILATIONS):
        for t in range(d):                                 # xm[t] = y[d - t]     (top edge)
            pm[u, t, d - t] = 1.0
        for t in range(Tout - d, Tout):                    # xp[t] = y[2(Tout-1) - t - d] (bottom)
            pp[u, t, 2 * (Tout - 1) - t - d - (Tout - EDGE)] = 1.0

    out_tlc = pl.pallas_call(
        _decblock_kernel,
        out_shape=jax.ShapeDtypeStruct((B, Tout, C), jnp.float32),
        grid=(B,),
        in_specs=[
            pl.BlockSpec((1, Tq, Cin), lambda b: (b, 0, 0)),
            pl.BlockSpec((K * Cin, C), lambda b: (0, 0)),
            pl.BlockSpec((len(DILATIONS), 3 * C, C), lambda b: (0, 0, 0)),
            pl.BlockSpec((len(DILATIONS), Tout, EDGE), lambda b: (0, 0, 0)),
            pl.BlockSpec((len(DILATIONS), Tout, EDGE), lambda b: (0, 0, 0)),
        ],
        out_specs=pl.BlockSpec((1, Tout, C), lambda b: (b, 0, 0)),
        compiler_params=pltpu.CompilerParams(dimension_semantics=("parallel",)),
    )(xq, wct_flat, wres, jnp.asarray(pm), jnp.asarray(pp))

    return jnp.transpose(out_tlc, (0, 2, 1))               # back to PyTorch NCL (B, C, Tout)


# ---------------------------- pure NumPy reference (float64) ----------------------------
def _leaky_np(v):
    return np.where(v > 0, v, NEG_SLOPE * v)


def ref_forward(x, enc, w_ct, w_dil, w_pt, stride):
    B, Cin, T = x.shape
    _, C, K = w_ct.shape
    S, P = stride, stride // 2
    Tout = (T - 1) * S - 2 * P + K
    xs = x + enc
    out = np.zeros((B, C, Tout))
    for b in range(B):
        yfull = np.zeros((C, (T - 1) * S + K))
        for j in range(T):
            for k in range(K):
                yfull[:, j * S + k] += w_ct[:, :, k].T @ xs[b, :, j]
        y = _leaky_np(yfull[:, P:P + Tout])
        for u, d in enumerate(DILATIONS):
            yp = np.pad(y, ((0, 0), (d, d)), mode="reflect")
            h = np.zeros((C, Tout))
            for t in range(Tout):
                h[:, t] = (w_dil[u, :, :, 0] @ yp[:, t]
                           + w_dil[u, :, :, 1] @ yp[:, t + d]
                           + w_dil[u, :, :, 2] @ yp[:, t + 2 * d])
            h = w_pt[u, :, :, 0] @ h
            y = y + _leaky_np(h)
        out[b] = y
    return out


if __name__ == "__main__":
    B, C, S, T = 2, 16, 4, 8          # batch, out_channels, stride, input length -> Tout = 32
    key = jax.random.PRNGKey(0)
    k1, k2, k3, kx, ke = jax.random.split(key, 5)

    def bf16_round(a):
        # The kernel feeds the MXU bf16 operands (f32 accumulation); round the test operands to
        # bf16 so the float64 reference sees the same values and the comparison stays tight.
        return lax.convert_element_type(lax.convert_element_type(a, jnp.bfloat16), jnp.float32)

    # Deterministic synthetic effective weights (shapes per the module __init__).
    w_ct = bf16_round(0.2 * jax.random.normal(k1, (2 * C, C, 2 * S), jnp.float32))  # (in, out, k)
    w_dil = bf16_round(0.2 * jax.random.normal(k2, (3, C, C, 3), jnp.float32))      # (out, in, 3)
    w_pt = bf16_round(0.2 * jax.random.normal(k3, (3, C, C, 1), jnp.float32))       # (out, in, 1)

    x = bf16_round(jax.random.normal(kx, (B, 2 * C, T), jnp.float32))
    enc = bf16_round(jax.random.normal(ke, (B, 2 * C, T), jnp.float32))

    out = jax.block_until_ready(dec_block_forward(x, enc, w_ct, w_dil, w_pt, S))

    ref = ref_forward(np.asarray(x, np.float64), np.asarray(enc, np.float64),
                      np.asarray(w_ct, np.float64), np.asarray(w_dil, np.float64),
                      np.asarray(w_pt, np.float64), S)
    # Residual mismatch: bf16 rounding of (x+enc) and of the host-folded residual weights,
    # plus f32 accumulation order — comfortably within 5e-2.
    np.testing.assert_allclose(np.asarray(out), ref, rtol=5e-2, atol=5e-2)
    print("KERNEL_OK")
</pallas_src>

<mosaic_0001>
module attributes {stable_mosaic.version = 11 : i64} {
  func.func @_decblock_kernel(%arg0: i32, %arg1: memref<1x39x32xf32, #tpu.memory_space<vmem>>, %arg2: memref<256x16xbf16, #tpu.memory_space<vmem>>, %arg3: memref<3x48x16xbf16, #tpu.memory_space<vmem>>, %arg4: memref<3x32x16xf32, #tpu.memory_space<vmem>>, %arg5: memref<3x32x16xf32, #tpu.memory_space<vmem>>, %arg6: memref<1x32x16xf32, #tpu.memory_space<vmem>>) attributes {dimension_semantics = [#tpu.dimension_semantics<parallel>], iteration_bounds = array<i64: 2>, scalar_prefetch = 0 : i64, scratch_operands = 0 : i64, tpu.core_type = #tpu.core_type<tc>, window_params = [{transform_indices = @transform_0, window_bounds = array<i64: 1, 39, 32>}, {pipeline_mode = #tpu.pipeline_mode<synchronous>, transform_indices = @transform_1, window_bounds = array<i64: 256, 16>}, {pipeline_mode = #tpu.pipeline_mode<synchronous>, transform_indices = @transform_2, window_bounds = array<i64: 3, 48, 16>}, {pipeline_mode = #tpu.pipeline_mode<synchronous>, transform_indices = @transform_3, window_bounds = array<i64: 3, 32, 16>}, {pipeline_mode = #tpu.pipeline_mode<synchronous>, transform_indices = @transform_4, window_bounds = array<i64: 3, 32, 16>}, {transform_indices = @transform_5, window_bounds = array<i64: 1, 32, 16>}]} {
    %c0 = arith.constant 0 : index
    %c0_0 = arith.constant 0 : index
    %c0_1 = arith.constant 0 : index
    %0 = vector.load %arg1[%c0, %c0_0, %c0_1] : memref<1x39x32xf32, #tpu.memory_space<vmem>>, vector<1x39x32xf32>
    %1 = vector.shape_cast %0 : vector<1x39x32xf32> to vector<39x32xf32>
    %2 = vector.extract_strided_slice %1 {offsets = [0, 0], sizes = [32, 32], strides = [1, 1]} : vector<39x32xf32> to vector<32x32xf32>
    %3 = vector.extract_strided_slice %1 {offsets = [1, 0], sizes = [32, 32], strides = [1, 1]} : vector<39x32xf32> to vector<32x32xf32>
    %4 = vector.extract_strided_slice %1 {offsets = [2, 0], sizes = [32, 32], strides = [1, 1]} : vector<39x32xf32> to vector<32x32xf32>
    %5 = vector.extract_strided_slice %1 {offsets = [3, 0], sizes = [32, 32], strides = [1, 1]} : vector<39x32xf32> to vector<32x32xf32>
    %6 = vector.extract_strided_slice %1 {offsets = [4, 0], sizes = [32, 32], strides = [1, 1]} : vector<39x32xf32> to vector<32x32xf32>
    %7 = vector.extract_strided_slice %1 {offsets = [5, 0], sizes = [32, 32], strides = [1, 1]} : vector<39x32xf32> to vector<32x32xf32>
    %8 = vector.extract_strided_slice %1 {offsets = [6, 0], sizes = [32, 32], strides = [1, 1]} : vector<39x32xf32> to vector<32x32xf32>
    %9 = vector.extract_strided_slice %1 {offsets = [7, 0], sizes = [32, 32], strides = [1, 1]} : vector<39x32xf32> to vector<32x32xf32>
    %10 = tpu.concatenate %2, %3, %4, %5, %6, %7, %8, %9 in 1 : vector<32x32xf32>, vector<32x32xf32>, vector<32x32xf32>, vector<32x32xf32>, vector<32x32xf32>, vector<32x32xf32>, vector<32x32xf32>, vector<32x32xf32> -> vector<32x256xf32>
    %11 = arith.truncf %10 : vector<32x256xf32> to vector<32x256xbf16>
    %c0_2 = arith.constant 0 : index
    %c0_3 = arith.constant 0 : index
    %12 = vector.load %arg2[%c0_2, %c0_3] : memref<256x16xbf16, #tpu.memory_space<vmem>>, vector<256x16xbf16>
    %cst = arith.constant dense<0.000000e+00> : vector<32x16xf32>
    %13 = tpu.matmul %11, %12, %cst {dimension_numbers = #tpu.dot_dimension_numbers<[1], [0], [0], [1], [0, 0, 1, 1], [], []>} : vector<32x256xbf16>, vector<256x16xbf16>, vector<32x16xf32> -> vector<32x16xf32>
    %cst_4 = arith.constant 0.000000e+00 : f32
    %14 = vector.broadcast %cst_4 : f32 to vector<32x16xf32>
    %15 = arith.cmpf ogt, %13, %14 : vector<32x16xf32>
    %cst_5 = arith.constant 0.00999999977 : f32
    %16 = vector.broadcast %cst_5 : f32 to vector<32x16xf32>
    %17 = arith.mulf %16, %13 : vector<32x16xf32>
    %18 = arith.select %15, %13, %17 : vector<32x16xi1>, vector<32x16xf32>
    %19 = tpu.iota {dimensions = array<i32: 0>} : vector<32x16xi32>
    %c0_6 = arith.constant 0 : index
    %c0_7 = arith.constant 0 : index
    %c0_8 = arith.constant 0 : index
    %20 = vector.load %arg4[%c0_6, %c0_7, %c0_8] : memref<3x32x16xf32, #tpu.memory_space<vmem>>, vector<1x32x16xf32>
    %21 = vector.shape_cast %20 : vector<1x32x16xf32> to vector<32x16xf32>
    %22 = vector.extract_strided_slice %18 {offsets = [0, 0], sizes = [16, 16], strides = [1, 1]} : vector<32x16xf32> to vector<16x16xf32>
    %cst_9 = arith.constant dense<0.000000e+00> : vector<32x16xf32>
    %23 = tpu.matmul %21, %22, %cst_9 {dimension_numbers = #tpu.dot_dimension_numbers<[1], [0], [0], [1], [0, 0, 1, 1], [], []>} : vector<32x16xf32>, vector<16x16xf32>, vector<32x16xf32> -> vector<32x16xf32>
    %c0_10 = arith.constant 0 : index
    %c0_11 = arith.constant 0 : index
    %c0_12 = arith.constant 0 : index
    %24 = vector.load %arg5[%c0_10, %c0_11, %c0_12] : memref<3x32x16xf32, #tpu.memory_space<vmem>>, vector<1x32x16xf32>
    %25 = vector.shape_cast %24 : vector<1x32x16xf32> to vector<32x16xf32>
    %26 = vector.extract_strided_slice %18 {offsets = [16, 0], sizes = [16, 16], strides = [1, 1]} : vector<32x16xf32> to vector<16x16xf32>
    %cst_13 = arith.constant dense<0.000000e+00> : vector<32x16xf32>
    %27 = tpu.matmul %25, %26, %cst_13 {dimension_numbers = #tpu.dot_dimension_numbers<[1], [0], [0], [1], [0, 0, 1, 1], [], []>} : vector<32x16xf32>, vector<16x16xf32>, vector<32x16xf32> -> vector<32x16xf32>
    %c1_i32 = arith.constant 1 : i32
    %28 = vector.broadcast %c1_i32 : i32 to vector<32x16xi32>
    %29 = arith.cmpi sge, %19, %28 : vector<32x16xi32>
    %c1_i32_14 = arith.constant 1 : i32
    %30 = tpu.dynamic_rotate %18 by %c1_i32_14 dim 0 : vector<32x16xf32>, i32 -> vector<32x16xf32>
    %31 = arith.select %29, %30, %23 : vector<32x16xi1>, vector<32x16xf32>
    %c31_i32 = arith.constant 31 : i32
    %32 = vector.broadcast %c31_i32 : i32 to vector<32x16xi32>
    %33 = arith.cmpi slt, %19, %32 : vector<32x16xi32>
    %c31_i32_15 = arith.constant 31 : i32
    %34 = tpu.dynamic_rotate %18 by %c31_i32_15 dim 0 : vector<32x16xf32>, i32 -> vector<32x16xf32>
    %35 = arith.select %33, %34, %27 : vector<32x16xi1>, vector<32x16xf32>
    %36 = tpu.concatenate %31, %18, %35 in 1 : vector<32x16xf32>, vector<32x16xf32>, vector<32x16xf32> -> vector<32x48xf32>
    %37 = arith.truncf %36 : vector<32x48xf32> to vector<32x48xbf16>
    %c0_16 = arith.constant 0 : index
    %c0_17 = arith.constant 0 : index
    %c0_18 = arith.constant 0 : index
    %38 = vector.load %arg3[%c0_16, %c0_17, %c0_18] : memref<3x48x16xbf16, #tpu.memory_space<vmem>>, vector<1x48x16xbf16>
    %39 = vector.shape_cast %38 : vector<1x48x16xbf16> to vector<48x16xbf16>
    %cst_19 = arith.constant dense<0.000000e+00> : vector<32x16xf32>
    %40 = tpu.matmul %37, %39, %cst_19 {dimension_numbers = #tpu.dot_dimension_numbers<[1], [0], [0], [1], [0, 0, 1, 1], [], []>} : vector<32x48xbf16>, vector<48x16xbf16>, vector<32x16xf32> -> vector<32x16xf32>
    %cst_20 = arith.constant 0.000000e+00 : f32
    %41 = vector.broadcast %cst_20 : f32 to vector<32x16xf32>
    %42 = arith.cmpf ogt, %40, %41 : vector<32x16xf32>
    %cst_21 = arith.constant 0.00999999977 : f32
    %43 = vector.broadcast %cst_21 : f32 to vector<32x16xf32>
    %44 = arith.mulf %43, %40 : vector<32x16xf32>
    %45 = arith.select %42, %40, %44 : vector<32x16xi1>, vector<32x16xf32>
    %46 = arith.addf %18, %45 : vector<32x16xf32>
    %c1 = arith.constant 1 : index
    %c0_22 = arith.constant 0 : index
    %c0_23 = arith.constant 0 : index
    %47 = vector.load %arg4[%c1, %c0_22, %c0_23] : memref<3x32x16xf32, #tpu.memory_space<vmem>>, vector<1x32x16xf32>
    %48 = vector.shape_cast %47 : vector<1x32x16xf32> to vector<32x16xf32>
    %49 = vector.extract_strided_slice %46 {offsets = [0, 0], sizes = [16, 16], strides = [1, 1]} : vector<32x16xf32> to vector<16x16xf32>
    %cst_24 = arith.constant dense<0.000000e+00> : vector<32x16xf32>
    %50 = tpu.matmul %48, %49, %cst_24 {dimension_numbers = #tpu.dot_dimension_numbers<[1], [0], [0], [1], [0, 0, 1, 1], [], []>} : vector<32x16xf32>, vector<16x16xf32>, vector<32x16xf32> -> vector<32x16xf32>
    %c1_25 = arith.constant 1 : index
    %c0_26 = arith.constant 0 : index
    %c0_27 = arith.constant 0 : index
    %51 = vector.load %arg5[%c1_25, %c0_26, %c0_27] : memref<3x32x16xf32, #tpu.memory_space<vmem>>, vector<1x32x16xf32>
    %52 = vector.shape_cast %51 : vector<1x32x16xf32> to vector<32x16xf32>
    %53 = vector.extract_strided_slice %46 {offsets = [16, 0], sizes = [16, 16], strides = [1, 1]} : vector<32x16xf32> to vector<16x16xf32>
    %cst_28 = arith.constant dense<0.000000e+00> : vector<32x16xf32>
    %54 = tpu.matmul %52, %53, %cst_28 {dimension_numbers = #tpu.dot_dimension_numbers<[1], [0], [0], [1], [0, 0, 1, 1], [], []>} : vector<32x16xf32>, vector<16x16xf32>, vector<32x16xf32> -> vector<32x16xf32>
    %c3_i32 = arith.constant 3 : i32
    %55 = vector.broadcast %c3_i32 : i32 to vector<32x16xi32>
    %56 = arith.cmpi sge, %19, %55 : vector<32x16xi32>
    %c3_i32_29 = arith.constant 3 : i32
    %57 = tpu.dynamic_rotate %46 by %c3_i32_29 dim 0 : vector<32x16xf32>, i32 -> vector<32x16xf32>
    %58 = arith.select %56, %57, %50 : vector<32x16xi1>, vector<32x16xf32>
    %c29_i32 = arith.constant 29 : i32
    %59 = vector.broadcast %c29_i32 : i32 to vector<32x16xi32>
    %60 = arith.cmpi slt, %19, %59 : vector<32x16xi32>
    %c29_i32_30 = arith.constant 29 : i32
    %61 = tpu.dynamic_rotate %46 by %c29_i32_30 dim 0 : vector<32x16xf32>, i32 -> vector<32x16xf32>
    %62 = arith.select %60, %61, %54 : vector<32x16xi1>, vector<32x16xf32>
    %63 = tpu.concatenate %58, %46, %62 in 1 : vector<32x16xf32>, vector<32x16xf32>, vector<32x16xf32> -> vector<32x48xf32>
    %64 = arith.truncf %63 : vector<32x48xf32> to vector<32x48xbf16>
    %c1_31 = arith.constant 1 : index
    %c0_32 = arith.constant 0 : index
    %c0_33 = arith.constant 0 : index
    %65 = vector.load %arg3[%c1_31, %c0_32, %c0_33] : memref<3x48x16xbf16, #tpu.memory_space<vmem>>, vector<1x48x16xbf16>
    %66 = vector.shape_cast %65 : vector<1x48x16xbf16> to vector<48x16xbf16>
    %cst_34 = arith.constant dense<0.000000e+00> : vector<32x16xf32>
    %67 = tpu.matmul %64, %66, %cst_34 {dimension_numbers = #tpu.dot_dimension_numbers<[1], [0], [0], [1], [0, 0, 1, 1], [], []>} : vector<32x48xbf16>, vector<48x16xbf16>, vector<32x16xf32> -> vector<32x16xf32>
    %cst_35 = arith.constant 0.000000e+00 : f32
    %68 = vector.broadcast %cst_35 : f32 to vector<32x16xf32>
    %69 = arith.cmpf ogt, %67, %68 : vector<32x16xf32>
    %cst_36 = arith.constant 0.00999999977 : f32
    %70 = vector.broadcast %cst_36 : f32 to vector<32x16xf32>
    %71 = arith.mulf %70, %67 : vector<32x16xf32>
    %72 = arith.select %69, %67, %71 : vector<32x16xi1>, vector<32x16xf32>
    %73 = arith.addf %46, %72 : vector<32x16xf32>
    %c2 = arith.constant 2 : index
    %c0_37 = arith.constant 0 : index
    %c0_38 = arith.constant 0 : index
    %74 = vector.load %arg4[%c2, %c0_37, %c0_38] : memref<3x32x16xf32, #tpu.memory_space<vmem>>, vector<1x32x16xf32>
    %75 = vector.shape_cast %74 : vector<1x32x16xf32> to vector<32x16xf32>
    %76 = vector.extract_strided_slice %73 {offsets = [0, 0], sizes = [16, 16], strides = [1, 1]} : vector<32x16xf32> to vector<16x16xf32>
    %cst_39 = arith.constant dense<0.000000e+00> : vector<32x16xf32>
    %77 = tpu.matmul %75, %76, %cst_39 {dimension_numbers = #tpu.dot_dimension_numbers<[1], [0], [0], [1], [0, 0, 1, 1], [], []>} : vector<32x16xf32>, vector<16x16xf32>, vector<32x16xf32> -> vector<32x16xf32>
    %c2_40 = arith.constant 2 : index
    %c0_41 = arith.constant 0 : index
    %c0_42 = arith.constant 0 : index
    %78 = vector.load %arg5[%c2_40, %c0_41, %c0_42] : memref<3x32x16xf32, #tpu.memory_space<vmem>>, vector<1x32x16xf32>
    %79 = vector.shape_cast %78 : vector<1x32x16xf32> to vector<32x16xf32>
    %80 = vector.extract_strided_slice %73 {offsets = [16, 0], sizes = [16, 16], strides = [1, 1]} : vector<32x16xf32> to vector<16x16xf32>
    %cst_43 = arith.constant dense<0.000000e+00> : vector<32x16xf32>
    %81 = tpu.matmul %79, %80, %cst_43 {dimension_numbers = #tpu.dot_dimension_numbers<[1], [0], [0], [1], [0, 0, 1, 1], [], []>} : vector<32x16xf32>, vector<16x16xf32>, vector<32x16xf32> -> vector<32x16xf32>
    %c9_i32 = arith.constant 9 : i32
    %82 = vector.broadcast %c9_i32 : i32 to vector<32x16xi32>
    %83 = arith.cmpi sge, %19, %82 : vector<32x16xi32>
    %c9_i32_44 = arith.constant 9 : i32
    %84 = tpu.dynamic_rotate %73 by %c9_i32_44 dim 0 : vector<32x16xf32>, i32 -> vector<32x16xf32>
    %85 = arith.select %83, %84, %77 : vector<32x16xi1>, vector<32x16xf32>
    %c23_i32 = arith.constant 23 : i32
    %86 = vector.broadcast %c23_i32 : i32 to vector<32x16xi32>
    %87 = arith.cmpi slt, %19, %86 : vector<32x16xi32>
    %c23_i32_45 = arith.constant 23 : i32
    %88 = tpu.dynamic_rotate %73 by %c23_i32_45 dim 0 : vector<32x16xf32>, i32 -> vector<32x16xf32>
    %89 = arith.select %87, %88, %81 : vector<32x16xi1>, vector<32x16xf32>
    %90 = tpu.concatenate %85, %73, %89 in 1 : vector<32x16xf32>, vector<32x16xf32>, vector<32x16xf32> -> vector<32x48xf32>
    %91 = arith.truncf %90 : vector<32x48xf32> to vector<32x48xbf16>
    %c2_46 = arith.constant 2 : index
    %c0_47 = arith.constant 0 : index
    %c0_48 = arith.constant 0 : index
    %92 = vector.load %arg3[%c2_46, %c0_47, %c0_48] : memref<3x48x16xbf16, #tpu.memory_space<vmem>>, vector<1x48x16xbf16>
    %93 = vector.shape_cast %92 : vector<1x48x16xbf16> to vector<48x16xbf16>
    %cst_49 = arith.constant dense<0.000000e+00> : vector<32x16xf32>
    %94 = tpu.matmul %91, %93, %cst_49 {dimension_numbers = #tpu.dot_dimension_numbers<[1], [0], [0], [1], [0, 0, 1, 1], [], []>} : vector<32x48xbf16>, vector<48x16xbf16>, vector<32x16xf32> -> vector<32x16xf32>
    %cst_50 = arith.constant 0.000000e+00 : f32
    %95 = vector.broadcast %cst_50 : f32 to vector<32x16xf32>
    %96 = arith.cmpf ogt, %94, %95 : vector<32x16xf32>
    %cst_51 = arith.constant 0.00999999977 : f32
    %97 = vector.broadcast %cst_51 : f32 to vector<32x16xf32>
    %98 = arith.mulf %97, %94 : vector<32x16xf32>
    %99 = arith.select %96, %94, %98 : vector<32x16xi1>, vector<32x16xf32>
    %100 = arith.addf %73, %99 : vector<32x16xf32>
    %c0_52 = arith.constant 0 : index
    %c0_53 = arith.constant 0 : index
    %c0_54 = arith.constant 0 : index
    %101 = vector.load %arg6[%c0_52, %c0_53, %c0_54] : memref<1x32x16xf32, #tpu.memory_space<vmem>>, vector<1x32x16xf32>
    %102 = vector.shape_cast %101 : vector<1x32x16xf32> to vector<32x16xf32>
    %103 = vector.shape_cast %100 : vector<32x16xf32> to vector<1x32x16xf32>
    tpu.vector_store %arg6[%c0_52, %c0_53, %c0_54], %103 {strides = array<i32>} : memref<1x32x16xf32, #tpu.memory_space<vmem>>, vector<1x32x16xf32>,
    return
  }
  func.func @transform_0(%arg0: i32) -> (i32, i32, i32) {
    %c0_i32 = arith.constant 0 : i32
    %c0_i32_0 = arith.constant 0 : i32
    %c0_i32_1 = arith.constant 0 : i32
    return %arg0, %c0_i32, %c0_i32_0 : i32, i32, i32
  }
  func.func @transform_1(%arg0: i32) -> (i32, i32) {
    %c0_i32 = arith.constant 0 : i32
    %c0_i32_0 = arith.constant 0 : i32
    %c0_i32_1 = arith.constant 0 : i32
    return %c0_i32, %c0_i32_0 : i32, i32
  }
  func.func @transform_2(%arg0: i32) -> (i32, i32, i32) {
    %c0_i32 = arith.constant 0 : i32
    %c0_i32_0 = arith.constant 0 : i32
    %c0_i32_1 = arith.constant 0 : i32
    %c0_i32_2 = arith.constant 0 : i32
    return %c0_i32, %c0_i32_0, %c0_i32_1 : i32, i32, i32
  }
  func.func @transform_3(%arg0: i32) -> (i32, i32, i32) {
    %c0_i32 = arith.constant 0 : i32
    %c0_i32_0 = arith.constant 0 : i32
    %c0_i32_1 = arith.constant 0 : i32
    %c0_i32_2 = arith.constant 0 : i32
    return %c0_i32, %c0_i32_0, %c0_i32_1 : i32, i32, i32
  }
  func.func @transform_4(%arg0: i32) -> (i32, i32, i32) {
    %c0_i32 = arith.constant 0 : i32
    %c0_i32_0 = arith.constant 0 : i32
    %c0_i32_1 = arith.constant 0 : i32
    %c0_i32_2 = arith.constant 0 : i32
    return %c0_i32, %c0_i32_0, %c0_i32_1 : i32, i32, i32
  }
  func.func @transform_5(%arg0: i32) -> (i32, i32, i32) {
    %c0_i32 = arith.constant 0 : i32
    %c0_i32_0 = arith.constant 0 : i32
    %c0_i32_1 = arith.constant 0 : i32
    return %arg0, %c0_i32, %c0_i32_0 : i32, i32, i32
  }
}

</mosaic_0001>

<bundles_post_ra>
// kernel: tpu_custom_call.1
= control target key start
LH: loop header
LB: loop body
LE: loop exit
PB: predicated region body
PF: predicated region fallthrough
CT: control target
= control target key end

     0   :  { %s1725_s18 = smov 0   ;;  %s2244_s0 = inlined_call_operand.vmem [shape: f32[2,39,32], index: 0, kind: input, shape index: {}]   ;;  %s2245_s1 = inlined_call_operand.vmem [shape: bf16[256,16], index: 1, kind: input, shape index: {}]   ;;  %s2246_s2 = inlined_call_operand.vmem [shape: bf16[3,48,16], index: 2, kind: input, shape index: {}]   ;;  %s2247_s3 = inlined_call_operand.vmem [shape: f32[3,32,16], index: 3, kind: input, shape index: {}]   ;;  %s2248_s4 = inlined_call_operand.vmem [shape: f32[3,32,16], index: 4, kind: input, shape index: {}]   ;;  %s2249_s5 = inlined_call_operand.vmem [shape: f32[2,32,16], index: 5, kind: output, shape index: {}]  }
   0x1 LB: > { %s1354_s19 = sadd.s32 4294967295, %s1689_s18   ;;  %p1358_p0 = scmp.ge.s32.totalorder %s1689_s18, 1  ;;  %s1689_s18 = sphi %s1725_s18, %s15_s18  }
   0x2   : > { %p187_p1 = scmp.lt.s32.totalorder %s1689_s18, 3 }
   0x4   : > { %p188_p2 = pnand %p1358_p0, %p187_p1 }
   0x5   : > { %p215_p3 = scmp.lt.s32.totalorder (!%p188_p2), %s1354_s19, 1  ;;  %s1691_s24 = smov (!%p188_p2), 64  }
   0x6   : > { %191 = sbr.rel (%p188_p2) target bundleno = 1531 (0x5fb), region = 40  ;;  %s1692_s25 = smov (!%p188_p2), 32  }
   0x7   : > { %s1693_s13 = smov (!%p188_p2), 96   ;;  %s1694_s14 = smov (!%p188_p2), 16  }
   0xb   : > { %s2251_s19 = smov (!%p215_p3, %s1354_s19), 1  ;;  %vm258_vm0 = vcmask 1045504   ;;  %vm236_vm1 = vcmask 1046528   ;;  %vm338_vm2 = vcmask 1041408   ;;  %vm316_vm3 = vcmask 1042432   ;;  %v1530_v27 = vld [vmem:[%s2245_s1 + $0x38] sm:$0xff] }
   0xc   : > { %s1550_s20 = smul.u32 40, %s2251_s19  ;;  %v1538_v29 = vld [vmem:[%s2245_s1 + $0x78] sm:$0xff]  ;;  %vm280_vm4 = vcmask 1044480   ;;  %541 = vmatpush.bf16.msra.mxu0 %v1530_v27  ;;  %v1529_v32 = vld [vmem:[%s2245_s1 + $0x30] sm:$0xff]  ;;  %vm360_vm5 = vcmask 1040384   ;;  %v1528_v46 = vld [vmem:[%s2245_s1 + $0x28] sm:$0xff] }
   0xd   : > { %560 = vmatpush.bf16.msra.mxu1 %v1538_v29  ;;  %v1537_v37 = vld [vmem:[%s2245_s1 + $0x70] sm:$0xff]  ;;  %v1536_v49 = vld [vmem:[%s2245_s1 + $0x68] sm:$0xff]  ;;  %v1527_v55 = vld [vmem:[%s2245_s1 + $0x20] sm:$0xff]  ;;  %vm382_vm6 = vcmask 261120   ;;  %vm387_vm7 = vcmask 523264   ;;  %vm392_vm8 = vcmask 785408  }
   0xe   : > { %s1739_s23 = scalar_lea.vmem %s2244_s0, %s1550_s20  ;;  %v1535_v59 = vld [vmem:[%s2245_s1 + $0x60] sm:$0xff]  ;;  %vm302_vm9 = vcmask 1043456   ;;  %vm600_vm12 = vcmask 130048  }
   0xf   : > { %v1742_v0 = vld [vmem:[%s1739_s23] sm:$0xff]  ;;  %v1745_v1 = vld [vmem:[%s1739_s23 + $0x8] sm:$0xff]  ;;  %v1748_v2 = vld [vmem:[%s1739_s23 + $0x10] sm:$0xff] }
  0x10   : > { %v259_v3 = vrot.slane %v1742_v0, 2  ;;  %v260_v4 = vrot.slane %v1745_v1, 2  ;;  %v262_v5 = vrot.slane %v1748_v2, 2  ;;  %v237_v6 = vrot.slane %v1742_v0, 1  ;;  %v1777_v25 = vld [vmem:[%s1739_s23 + $0x18] sm:$0xff]  ;;  %542 = vmatpush.bf16.msra.mxu0 %v1529_v32  ;;  %v1531_v27 = vld [vmem:[%s2245_s1 + $0x40] sm:$0xff] }
  0x11   : > { %v238_v7 = vrot.slane %v1745_v1, 1  ;;  %v240_v8 = vrot.slane %v1748_v2, 1  ;;  %v339_v9 = vrot.slane %v1742_v0, 6  ;;  %v340_v12 = vrot.slane %v1745_v1, 6  ;;  %v1780_v26 = vld [vmem:[%s1739_s23 + $0x20] sm:$0x7f]  ;;  %561 = vmatpush.bf16.msra.mxu1 %v1537_v37 }
  0x12   : > { %v261_v10 = vsel %vm258_vm0, %v259_v3, %v260_v4  ;;  %v263_v11 = vsel %vm258_vm0, %v260_v4, %v262_v5  ;;  %v342_v13 = vrot.slane %v1748_v2, 6  ;;  %v317_v17 = vrot.slane %v1742_v0, 5  ;;  %v1526_v4 = vld [vmem:[%s2245_s1 + $0x18] sm:$0xff] }
  0x13   : > { %v1573_v14 = vpack.i.bf16 %v263_v11, %v261_v10  ;;  %v239_v15 = vsel %vm236_vm1, %v237_v6, %v238_v7  ;;  %v241_v16 = vsel %vm236_vm1, %v238_v7, %v240_v8  ;;  %v318_v19 = vrot.slane %v1745_v1, 5 }
  0x14   : > { %v1563_v18 = vpack.i.bf16 %v241_v16, %v239_v15  ;;  %v320_v20 = vrot.slane %v1748_v2, 5  ;;  %v341_v21 = vsel %vm338_vm2, %v339_v9, %v340_v12  ;;  %v343_v22 = vsel %vm338_vm2, %v340_v12, %v342_v13  ;;  %543 = vmatpush.bf16.msra.mxu0 %v1528_v46 }
  0x15   : > { %1574 = vrot.lane.b32.xlu1 %v1573_v14, %s1691_s24  ;;  %v319_v23 = vsel %vm316_vm3, %v317_v17, %v318_v19  ;;  %v284_v28 = vrot.slane %v1748_v2, 3  ;;  %v1578_v30 = vpack.i.bf16 %v343_v22, %v341_v21  ;;  %v281_v31 = vrot.slane %v1742_v0, 3  ;;  %562 = vmatpush.bf16.msra.mxu1 %v1536_v49  ;;  %v1525_v14 = vld [vmem:[%s2245_s1 + $0x10] sm:$0xff]  ;;  %v1534_v21 = vld [vmem:[%s2245_s1 + $0x58] sm:$0xff]  ;;  %v1523_v22 = vld [vmem:[%s2245_s1] sm:$0xff] }
  0x16   : > { %1564 = vrot.lane.b32.xlu0 %v1563_v18, %s1692_s25  ;;  %v321_v24 = vsel %vm316_vm3, %v318_v19, %v320_v20  ;;  %v322_v34 = vrot.slane %v1777_v25, 5  ;;  %v324_v35 = vrot.slane %v1780_v26, 5  ;;  %v282_v36 = vrot.slane %v1745_v1, 3 }
  0x17   : > { %v1568_v33 = vpack.i.bf16 %v321_v24, %v319_v23  ;;  %v242_v38 = vrot.slane %v1777_v25, 1  ;;  %v244_v39 = vrot.slane %v1780_v26, 1  ;;  %v361_v40 = vrot.slane %v1742_v0, 7  ;;  %v1533_v23 = vld [vmem:[%s2245_s1 + $0x50] sm:$0xff]  ;;  %v1532_v24 = vld [vmem:[%s2245_s1 + $0x48] sm:$0xff] }
  0x18   : > { %v283_v41 = vsel %vm280_vm4, %v281_v31, %v282_v36  ;;  %v285_v42 = vsel %vm280_vm4, %v282_v36, %v284_v28  ;;  %v362_v43 = vrot.slane %v1745_v1, 7  ;;  %v364_v44 = vrot.slane %v1748_v2, 7  ;;  %544 = vmatpush.bf16.msra.mxu0 %v1527_v55 }
  0x19   : > { %v1583_v45 = vpack.i.bf16 %v285_v42, %v283_v41  ;;  %v323_v47 = vsel %vm316_vm3, %v320_v20, %v322_v34  ;;  %v325_v48 = vsel %vm316_vm3, %v322_v34, %v324_v35  ;;  %v243_v50 = vsel %vm236_vm1, %v240_v8, %v242_v38  ;;  %563 = vmatpush.bf16.msra.mxu1 %v1535_v59  ;;  %v1524_v20 = vld [vmem:[%s2245_s1 + $0x8] sm:$0xff] }
  0x1a   : > { %v245_v51 = vsel %vm236_vm1, %v242_v38, %v244_v39  ;;  %v363_v52 = vsel %vm360_vm5, %v361_v40, %v362_v43  ;;  %v365_v53 = vsel %vm360_vm5, %v362_v43, %v364_v44  ;;  %v1598_v54 = vpack.i.bf16 %v325_v48, %v323_v47 }
  0x1b   : > { %1584 = vrot.lane.b32.xlu2 %v1583_v45, %s1693_s13  ;;  %v1593_v56 = vpack.i.bf16 %v245_v51, %v243_v50  ;;  %v286_v57 = vrot.slane %v1777_v25, 3  ;;  %v288_v58 = vrot.slane %v1780_v26, 3  ;;  %v344_v60 = vrot.slane %v1777_v25, 6 }
  0x1c   : > { %v346_v61 = vrot.slane %v1780_v26, 6  ;;  %v1588_v62 = vpack.i.bf16 %v365_v53, %v363_v52  ;;  %v264_v63 = vrot.slane %v1777_v25, 2  ;;  %v266_v3 = vrot.slane %v1780_v26, 2  ;;  %545 = vmatpush.bf16.msra.mxu0 %v1526_v4 }
  0x1d   : > { %1579 = vrot.lane.b32.xlu1 %v1578_v30, %s1691_s24  ;;  %v287_v6 = vsel %vm280_vm4, %v284_v28, %v286_v57  ;;  %v289_v7 = vsel %vm280_vm4, %v286_v57, %v288_v58  ;;  %v345_v8 = vsel %vm338_vm2, %v342_v13, %v344_v60  ;;  %v366_v13 = vrot.slane %v1777_v25, 7  ;;  %564 = vmatpush.bf16.msra.mxu1 %v1534_v21 }
  0x1e   : > { %1569 = vrot.lane.b32.xlu0 %v1568_v33, %s1692_s25  ;;  %v347_v9 = vsel %vm338_vm2, %v344_v60, %v346_v61  ;;  %v265_v10 = vsel %vm258_vm0, %v262_v5, %v264_v63  ;;  %v267_v11 = vsel %vm258_vm0, %v264_v63, %v266_v3  ;;  %v1613_v12 = vpack.i.bf16 %v289_v7, %v287_v6 }
  0x1f   : > { %v1608_v15 = vpack.i.bf16 %v347_v9, %v345_v8  ;;  %v1603_v16 = vpack.i.bf16 %v267_v11, %v265_v10  ;;  %v368_v17 = vrot.slane %v1780_v26, 7  ;;  %v367_v5 = vsel %vm360_vm5, %v364_v44, %v366_v13 }
  0x20   : > { %546 = vmatpush.bf16.msra.mxu0 %v1525_v14  ;;  %v303_v40 = vrot.slane %v1742_v0, 4  ;;  %v304_v41 = vrot.slane %v1745_v1, 4  ;;  %v306_v42 = vrot.slane %v1748_v2, 4  ;;  %v308_v8 = vrot.slane %v1777_v25, 4 }
  0x21   : > { %v369_v18 = vsel %vm360_vm5, %v366_v13, %v368_v17  ;;  %565 = vmatpush.bf16.msra.mxu1 %v1533_v23  ;;  %v310_v9 = vrot.slane %v1780_v26, 4  ;;  %vm787_vm2 = vcmask 392192  }
  0x22   : > { %v1618_v19 = vpack.i.bf16 %v369_v18, %v367_v5  ;;  %v305_v51 = vsel %vm302_vm9, %v303_v40, %v304_v41  ;;  %v309_v17 = vsel %vm302_vm9, %v306_v42, %v308_v8 }
  0x23   : > { %1589 = vrot.lane.b32.xlu2 %v1588_v62, %s1693_s13  ;;  %v311_v5 = vsel %vm302_vm9, %v308_v8, %v310_v9  ;;  %v644_v8 = vld [vmem:[%s2248_s4 + $0x10] sm:$0xff]  ;;  %v645_v9 = vld [vmem:[%s2248_s4 + $0x18] sm:$0xff] }
  0x24   : > { %547 = vmatpush.bf16.msra.mxu0 %v1524_v20 }
  0x25   : > { %1599 = vrot.lane.b32.xlu1 %v1598_v54, %s1692_s25  ;;  %566 = vmatpush.bf16.msra.mxu1 %v1532_v24 }
  0x26   : > { %1594 = vrot.lane.b32.xlu0 %v1593_v56, %s1692_s25 }
  0x28   : > { %548 = vmatpush.bf16.msra.mxu0 %v1523_v22 }
  0x29   : > { %567 = vmatpush.bf16.msra.mxu1 %v1531_v27 }
  0x2b   : > { %1604 = vrot.lane.b32.xlu2 %v1603_v16, %s1691_s24 }
  0x2d   : > { %1614 = vrot.lane.b32.xlu1 %v1613_v12, %s1693_s13 }
  0x2e   : > { %1609 = vrot.lane.b32.xlu0 %v1608_v15, %s1691_s24 }
  0x33   : > { %1619 = vrot.lane.b32.xlu2 %v1618_v19, %s1693_s13 }
  0x75   : > { %v1585_v28 = vpop.permute.xlu2 %1584 }
  0x76   : > { %v1587_v35 = vunpack.i.h.bf16 %v1585_v28  ;;  %v1586_v36 = vunpack.i.l.bf16 %v1585_v28 }
  0x7d   : > { %v1590_v37 = vpop.permute.xlu2 %1589 }
  0x7e   : > { %v1592_v54 = vunpack.i.h.bf16 %v1590_v37  ;;  %v1591_v55 = vunpack.i.l.bf16 %v1590_v37 }
  0x85   : > { %v1605_v58 = vpop.permute.xlu2 %1604 }
  0x86   : > { %v1607_v10 = vunpack.i.h.bf16 %v1605_v58  ;;  %v1606_v11 = vunpack.i.l.bf16 %v1605_v58 }
  0x87   : > { %v1575_v29 = vpop.permute.xlu1 %1574 }
  0x88   : > { %v1577_v30 = vunpack.i.h.bf16 %v1575_v29  ;;  %v1576_v31 = vunpack.i.l.bf16 %v1575_v29  ;;  %v1565_v32 = vpop.permute.xlu0 %1564 }
  0x89   : > { %v1567_v33 = vunpack.i.h.bf16 %v1565_v32  ;;  %v1566_v34 = vunpack.i.l.bf16 %v1565_v32 }
  0x8b   : > { %v384_v38 = vsel %vm382_vm6, %v1745_v1, %v1567_v33  ;;  %v383_v39 = vsel %vm382_vm6, %v1742_v0, %v1566_v34  ;;  %v307_v0 = vsel %vm302_vm9, %v304_v41, %v306_v42 }
  0x8c   : > { %v388_v43 = vsel %vm387_vm7, %v383_v39, %v1576_v31  ;;  %v389_v44 = vsel %vm387_vm7, %v384_v38, %v1577_v30 }
  0x8d   : > { %v393_v45 = vsel %vm392_vm8, %v388_v43, %v1586_v36  ;;  %v394_v46 = vsel %vm392_vm8, %v389_v44, %v1587_v35  ;;  %v1620_v12 = vpop.permute.xlu2 %1619 }
  0x8e   : > { %v409_v47 = vpack.c.bf16 %v394_v46, %v393_v45  ;;  %v1622_v26 = vunpack.i.h.bf16 %v1620_v12  ;;  %v1621_v22 = vunpack.i.l.bf16 %v1620_v12  ;;  %v1541_v12 = vld [vmem:[%s2246_s2 + $0x10] sm:$0xff] }
  0x8f   : > { %v1580_v48 = vpop.permute.xlu1 %1579 }
  0x90   : > { %v1582_v49 = vunpack.i.h.bf16 %v1580_v48  ;;  %v1581_v50 = vunpack.i.l.bf16 %v1580_v48  ;;  %v1570_v1 = vpop.permute.xlu0 %1569  ;;  %549 = vmatmul.bf16.vlgmr.msra.gmra.mxu0 %v409_v47  ;;  %v591_v47 = vlaneseq }
  0x91   : > { %v1572_v52 = vunpack.i.h.bf16 %v1570_v1  ;;  %v1571_v53 = vunpack.i.l.bf16 %v1570_v1 }
  0x92   : > { %v1928_v1 = vshrl.u32 %v591_v47, 7 }
  0x93   : > { %v398_v56 = vsel %vm382_vm6, %v307_v0, %v1572_v52  ;;  %v397_v57 = vsel %vm382_vm6, %v305_v51, %v1571_v53 }
  0x94   : > { %v401_v59 = vsel %vm387_vm7, %v397_v57, %v1581_v50  ;;  %v402_v60 = vsel %vm387_vm7, %v398_v56, %v1582_v49  ;;  %v596_v50 = vld [vmem:[%s2247_s3] sm:$0xff]  ;;  %vm712_vm14 = vcmp.lt.s32.totalorder %v1928_v1, 7  ;;  %vm695_vm0 = vcmp.lt.s32.totalorder %v1928_v1, 1 }
  0x95   : > { %v405_v61 = vsel %vm392_vm8, %v401_v59, %v1591_v55  ;;  %v406_v62 = vsel %vm392_vm8, %v402_v60, %v1592_v54  ;;  %vm687_vm1 = vcmp.ge.s32.totalorder %v1928_v1, 1 }
  0x96   : > { %v410_v63 = vpack.c.bf16 %v406_v62, %v405_v61 }
  0x97   : > { %v1600_v3 = vpop.permute.xlu1 %1599 }
  0x98   : > { %v1595_v4 = vpop.permute.xlu0 %1594  ;;  %568 = vmatmul.bf16.vlgmr.msra.gmra.mxu1 %v410_v63  ;;  %v1602_v14 = vunpack.i.h.bf16 %v1600_v3  ;;  %v1601_v15 = vunpack.i.l.bf16 %v1600_v3 }
  0x99   : > { %v1597_v6 = vunpack.i.h.bf16 %v1595_v4  ;;  %v1596_v7 = vunpack.i.l.bf16 %v1595_v4 }
  0x9b   : > { %v386_v16 = vsel %vm382_vm6, %v1777_v25, %v1597_v6  ;;  %v385_v13 = vsel %vm382_vm6, %v1748_v2, %v1596_v7  ;;  %v400_v25 = vsel %vm382_vm6, %v311_v5, %v1602_v14  ;;  %v399_v2 = vsel %vm382_vm6, %v309_v17, %v1601_v15  ;;  %v642_v6 = vld [vmem:[%s2248_s4] sm:$0xff]  ;;  %v643_v7 = vld [vmem:[%s2248_s4 + $0x8] sm:$0xff]  ;;  %v599_v14 = vld [vmem:[%s2247_s3 + $0x18] sm:$0xff] }
  0x9c   : > { %v390_v27 = vsel %vm387_vm7, %v385_v13, %v1606_v11  ;;  %v391_v28 = vsel %vm387_vm7, %v386_v16, %v1607_v10  ;;  %v597_v10 = vld [vmem:[%s2247_s3 + $0x8] sm:$0xff]  ;;  %v598_v11 = vld [vmem:[%s2247_s3 + $0x10] sm:$0xff]  ;;  %v1539_v16 = vld [vmem:[%s2246_s2] sm:$0xff] }
  0x9d   : > { %v1540_v15 = vld [vmem:[%s2246_s2 + $0x8] sm:$0xff] }
  0x9f   : > { %v1615_v18 = vpop.permute.xlu1 %1614 }
  0xa0   : > { %v1617_v19 = vunpack.i.h.bf16 %v1615_v18  ;;  %v1616_v20 = vunpack.i.l.bf16 %v1615_v18  ;;  %v1610_v21 = vpop.permute.xlu0 %1609 }
  0xa1   : > { %v1612_v23 = vunpack.i.h.bf16 %v1610_v21  ;;  %v1611_v24 = vunpack.i.l.bf16 %v1610_v21 }
  0xa2   : > { %v395_v29 = vsel %vm392_vm8, %v390_v27, %v1616_v20  ;;  %v396_v30 = vsel %vm392_vm8, %v391_v28, %v1617_v19 }
  0xa3   : > { %v411_v31 = vpack.c.bf16 %v396_v30, %v395_v29  ;;  %v403_v32 = vsel %vm387_vm7, %v399_v2, %v1611_v24  ;;  %v404_v33 = vsel %vm387_vm7, %v400_v25, %v1612_v23 }
  0xa4   : > { %v407_v34 = vsel %vm392_vm8, %v403_v32, %v1621_v22  ;;  %v408_v35 = vsel %vm392_vm8, %v404_v33, %v1622_v26  ;;  %vm946_vm8 = vcmp.lt.s32.totalorder %v1928_v1, 5 }
  0xa5   : > { %554 = vmatmul.bf16.gmra.mxu0 %v411_v31  ;;  %v412_v36 = vpack.c.bf16 %v408_v35, %v407_v34  ;;  %v2004_v35 = vadd.s32 24, %v1928_v1 }
  0xa7   : > { %vm707_vm3 = vcmp.lt.s32.totalorder %v2004_v35, 31 }
  0xa8   : > { %573 = vmatmul.bf16.gmra.mxu1 %v412_v36 }
 0x10d   : > { %v550_v37 = vpop.f32.mrf.mxu0 }
 0x115   : > { %v569_v38 = vpop.f32.mrf.mxu1  ;;  %v552_v40 = vpop.f32.mrf.mxu0 }
 0x116   : > { %v570_v39 = vadd.f32 %v569_v38, %v550_v37 }
 0x118   : > { %v583_v42 = vmul.f32 0.01, %v570_v39  ;;  %vm579_vm10 = vcmp.gt.f32.partialorder %v570_v39, 0.0 }
 0x11a   : > { %v1915_v45 = vsel %vm579_vm10, %v570_v39, %v583_v42  ;;  %vm929_vm10 = vcmp.lt.s32.totalorder %v1928_v1, 3 }
 0x11b   : > { %v708_v55 = vrot.slane %v1915_v45, 1  ;;  %v691_v19 = vrot.slane %v1915_v45, 7 }
 0x11d   : > { %v571_v41 = vpop.f32.mrf.mxu1 }
 0x11e   : > { %v572_v43 = vadd.f32 %v571_v41, %v552_v40 }
 0x120   : > { %vm580_vm11 = vcmp.gt.f32.partialorder %v572_v43, 0.0  ;;  %v584_v44 = vmul.f32 0.01, %v572_v43 }
 0x122   : > { %v1917_v46 = vsel %vm580_vm11, %v572_v43, %v584_v44  ;;  %v555_v48 = vpop.f32.mrf.mxu0  ;;  %vm921_vm11 = vcmp.ge.s32.totalorder %v1928_v1, 3 }
 0x123   : > { %627 = vmatpush.msra.mxu2 %v1917_v46  ;;  %v1623_v49 = vpack.i.bf16 %v1917_v46, %v1915_v45  ;;  %v709_v53 = vrot.slane %v1917_v46, 1  ;;  %v692_v18 = vrot.slane %v1917_v46, 7 }
 0x125   : > { %v574_v51 = vpop.f32.mrf.mxu1  ;;  %1624 = vrot.lane.b32.xlu0 %v1623_v49, %s1694_s14  ;;  %628 = vmatpush.msra.mxu2 %v1915_v45  ;;  %v715_v60 = vsel %vm712_vm14, %v708_v55, %v709_v53  ;;  %v698_v24 = vsel %vm695_vm0, %v691_v19, %v692_v18 }
 0x126   : > { %v575_v0 = vadd.f32 %v574_v51, %v555_v48  ;;  %1426 = vmatmul.msk.f32.vlgmr.msra.gmra.mxu2 %vm600_vm12, %v596_v50 }
 0x127   : > { %799 = vmatpush.bf16.msrb.mxu2 %v1541_v12 }
 0x128   : > { %vm581_vm13 = vcmp.gt.f32.partialorder %v575_v0, 0.0  ;;  %v585_v52 = vmul.f32 0.01, %v575_v0 }
 0x12a   : > { %v1931_v54 = vsel %vm581_vm13, %v575_v0, %v585_v52  ;;  %v557_v57 = vpop.f32.mrf.mxu0  ;;  %vm941_vm13 = vcmp.lt.s32.totalorder %v2004_v35, 29 }
 0x12b   : > { %v710_v56 = vrot.slane %v1931_v54, 1  ;;  %800 = vmatpush.bf16.msrb.mxu2 %v1540_v15 }
 0x12d   : > { %v576_v58 = vpop.f32.mrf.mxu1  ;;  %v714_v59 = vsel %vm712_vm14, %v709_v53, %v710_v56 }
 0x12e   : > { %v577_v61 = vadd.f32 %v576_v58, %v557_v57  ;;  %v1628_v62 = vpack.i.bf16 %v714_v59, %v715_v60  ;;  %1427 = vmatmul.msk.f32.gmra.mxu2 %vm600_vm12, %v597_v10 }
 0x12f   : > { %801 = vmatpush.bf16.msrb.mxu2 %v1539_v16 }
 0x130   : > { %vm582_vm15 = vcmp.gt.f32.partialorder %v577_v61, 0.0  ;;  %v586_v63 = vmul.f32 0.01, %v577_v61  ;;  %1629 = vrot.lane.b32.xlu1 %v1628_v62, %s1692_s25 }
 0x132   : > { %v1945_v3 = vsel %vm582_vm15, %v577_v61, %v586_v63 }
 0x133   : > { %672 = vmatpush.msra.mxu3 %v1945_v3  ;;  %v1633_v4 = vpack.i.bf16 %v1945_v3, %v1931_v54  ;;  %v694_v17 = vrot.slane %v1945_v3, 7  ;;  %v711_v36 = vrot.slane %v1945_v3, 1 }
 0x135   : > { %1634 = vrot.lane.b32.xlu2 %v1633_v4, %s1694_s14  ;;  %673 = vmatpush.msra.mxu3 %v1931_v54  ;;  %v699_v23 = vsel %vm695_vm0, %v694_v17, %v691_v19  ;;  %v716_v38 = vsel %vm712_vm14, %v711_v36, %v708_v55  ;;  %v713_v39 = vsel %vm712_vm14, %v710_v56, %v711_v36  ;;  %v1448_v56 = vld [vmem:[%s2247_s3 + $0x20] sm:$0xff] }
 0x136   : > { %1430 = vmatmul.msk.f32.vlgmr.msra.gmra.mxu3 %vm600_vm12, %v642_v6  ;;  %1428 = vmatmul.msk.f32.gmra.mxu2 %vm600_vm12, %v598_v11 }
 0x13e   : > { %1431 = vmatmul.msk.f32.gmra.mxu3 %vm600_vm12, %v643_v7  ;;  %1429 = vmatmul.msk.f32.gmra.mxu2 %vm600_vm12, %v599_v14 }
 0x146   : > { %1432 = vmatmul.msk.f32.gmra.mxu3 %vm600_vm12, %v644_v8 }
 0x14e   : > { %1433 = vmatmul.msk.f32.gmra.mxu3 %vm600_vm12, %v645_v9 }
 0x18f   : > { %v1635_v57 = vpop.permute.xlu2 %1634 }
 0x190   : > { %v1636_v58 = vunpack.i.l.bf16 %v1635_v57 }
 0x197   : > { %v1625_v13 = vpop.permute.xlu0 %1624 }
 0x198   : > { %v1627_v20 = vunpack.i.h.bf16 %v1625_v13  ;;  %v1626_v26 = vunpack.i.l.bf16 %v1625_v13 }
 0x19a   : > { %v754_v25 = vsel %vm600_vm12, %v698_v24, %v1627_v20  ;;  %v1459_v24 = vld [vmem:[%s2248_s4 + $0x38] sm:$0xff] }
 0x1a2   : > { %v1630_v5 = vpop.permute.xlu1 %1629 }
 0x1a3   : > { %v1632_v21 = vunpack.i.h.bf16 %v1630_v5  ;;  %v1631_v27 = vunpack.i.l.bf16 %v1630_v5 }
 0x1a5   : > { %v758_v29 = vsel %vm382_vm6, %v754_v25, %v1632_v21 }
 0x1a9   : > { %v630_v22 = vpop.f32.mrf.mxu2 }
 0x1aa   : > { %v700_v28 = vsel %vm687_vm1, %v699_v23, %v630_v22  ;;  %v1458_v22 = vld [vmem:[%s2248_s4 + $0x30] sm:$0xff]  ;;  %v1544_v23 = vld [vmem:[%s2246_s2 + $0x28] sm:$0xff] }
 0x1ab   : > { %v753_v2 = vsel %vm600_vm12, %v700_v28, %v1626_v26 }
 0x1ac   : > { %v757_v30 = vsel %vm382_vm6, %v753_v2, %v1631_v27  ;;  %v1542_v27 = vld [vmem:[%s2246_s2 + $0x18] sm:$0xff] }
 0x1ad   : > { %v761_v31 = vpack.c.bf16 %v758_v29, %v757_v30 }
 0x1af   : > { %1446 = vmatmul.msk.bf16.vlgmr.msrb.gmra.mxu2 %vm787_vm2, %v761_v31 }
 0x1b1   : > { %v633_v42 = vpop.f32.mrf.mxu2 }
 0x1b9   : > { %v675_v32 = vpop.f32.mrf.mxu3  ;;  %v636_v43 = vpop.f32.mrf.mxu2 }
 0x1c1   : > { %v678_v33 = vpop.f32.mrf.mxu3  ;;  %v639_v44 = vpop.f32.mrf.mxu2 }
 0x1c9   : > { %v681_v34 = vpop.f32.mrf.mxu3 }
 0x1d1   : > { %v684_v37 = vpop.f32.mrf.mxu3 }
 0x1d2   : > { %v720_v40 = vsel %vm707_vm3, %v716_v38, %v684_v37 }
 0x1d3   : > { %v1638_v41 = vpack.i.bf16 %v720_v40, %v713_v39 }
 0x1d5   : > { %1639 = vrot.lane.b32.xlu0 %v1638_v41, %s1692_s25 }
 0x232   : > { %v803_v47 = vpop.f32.mrf.mxu2 }
 0x233   : > { %v817_v48 = vmul.f32 0.01, %v803_v47  ;;  %vm813_vm4 = vcmp.gt.f32.partialorder %v803_v47, 0.0 }
 0x235   : > { %v821_v50 = vsel %vm813_vm4, %v803_v47, %v817_v48 }
 0x236   : > { %v2018_v52 = vadd.f32 %v821_v50, %v1915_v45  ;;  %v693_v45 = vrot.slane %v1931_v54, 7 }
 0x238   : > { %v697_v60 = vsel %vm695_vm0, %v692_v18, %v693_v45  ;;  %v696_v61 = vsel %vm695_vm0, %v693_v45, %v694_v17  ;;  %v942_v16 = vrot.slane %v2018_v52, 3  ;;  %v925_v25 = vrot.slane %v2018_v52, 5 }
 0x239   : > { %v755_v4 = vsel %vm600_vm12, %v697_v60, %v1636_v58 }
 0x23a   : > { %v805_v49 = vpop.f32.mrf.mxu2 }
 0x23b   : > { %vm814_vm5 = vcmp.gt.f32.partialorder %v805_v49, 0.0  ;;  %v818_v51 = vmul.f32 0.01, %v805_v49 }
 0x23d   : > { %v822_v0 = vsel %vm814_vm5, %v805_v49, %v818_v51 }
 0x23e   : > { %v2021_v53 = vadd.f32 %v822_v0, %v1917_v46  ;;  %v1637_v46 = vunpack.i.h.bf16 %v1635_v57 }
 0x240   : > { %860 = vmatpush.msrb.mxu3 %v2021_v53  ;;  %v1643_v55 = vpack.i.bf16 %v2021_v53, %v2018_v52  ;;  %v756_v6 = vsel %vm600_vm12, %v696_v61, %v1637_v46  ;;  %v943_v15 = vrot.slane %v2021_v53, 3  ;;  %v926_v31 = vrot.slane %v2021_v53, 5 }
 0x242   : > { %1644 = vrot.lane.b32.xlu1 %v1643_v55, %s1694_s14  ;;  %861 = vmatpush.msrb.mxu3 %v2018_v52  ;;  %v949_v18 = vsel %vm946_vm8, %v942_v16, %v943_v15  ;;  %v932_v37 = vsel %vm929_vm10, %v925_v25, %v926_v31 }
 0x243   : > { %1452 = vmatmul.msk.f32.vlgmr.msrb.gmra.mxu3 %vm600_vm12, %v1448_v56 }
 0x247   : > { %v1640_v59 = vpop.permute.xlu0 %1639 }
 0x248   : > { %v1642_v62 = vunpack.i.h.bf16 %v1640_v59  ;;  %v1641_v63 = vunpack.i.l.bf16 %v1640_v59 }
 0x24a   : > { %v759_v7 = vsel %vm382_vm6, %v755_v4, %v1641_v63  ;;  %v760_v8 = vsel %vm382_vm6, %v756_v6, %v1642_v62  ;;  %v1484_v62 = vld [vmem:[%s2247_s3 + $0x40] sm:$0xff] }
 0x24b   : > { %v762_v9 = vpack.c.bf16 %v760_v8, %v759_v7 }
 0x24d   : > { %1447 = vmatmul.msk.bf16.gmra.mxu2 %vm787_vm2, %v762_v9 }
 0x2b4   : > { %v1645_v2 = vpop.permute.xlu1 %1644 }
 0x2b5   : > { %v1647_v32 = vunpack.i.h.bf16 %v1645_v2  ;;  %v1646_v34 = vunpack.i.l.bf16 %v1645_v2  ;;  %v1492_v2 = vld [vmem:[%s2248_s4 + $0x40] sm:$0xff] }
 0x2b7   : > { %v988_v40 = vsel %vm600_vm12, %v932_v37, %v1647_v32  ;;  %v1547_v37 = vld [vmem:[%s2246_s2 + $0x40] sm:$0xff] }
 0x2c6   : > { %v863_v29 = vpop.f32.mrf.mxu3 }
 0x2d0   : > { %v808_v10 = vpop.f32.mrf.mxu2 }
 0x2d1   : > { %vm815_vm7 = vcmp.gt.f32.partialorder %v808_v10, 0.0  ;;  %v819_v11 = vmul.f32 0.01, %v808_v10 }
 0x2d3   : > { %v823_v12 = vsel %vm815_vm7, %v808_v10, %v819_v11 }
 0x2d4   : > { %v2043_v14 = vadd.f32 %v823_v12, %v1931_v54 }
 0x2d6   : > { %v944_v13 = vrot.slane %v2043_v14, 3  ;;  %v927_v63 = vrot.slane %v2043_v14, 5 }
 0x2d8   : > { %v810_v17 = vpop.f32.mrf.mxu2  ;;  %v948_v5 = vsel %vm946_vm8, %v943_v15, %v944_v13  ;;  %v931_v8 = vsel %vm929_vm10, %v926_v31, %v927_v63 }
 0x2d9   : > { %vm816_vm9 = vcmp.gt.f32.partialorder %v810_v17, 0.0  ;;  %v820_v19 = vmul.f32 0.01, %v810_v17  ;;  %v1648_v20 = vpack.i.bf16 %v948_v5, %v949_v18  ;;  %v1449_v5 = vld [vmem:[%s2247_s3 + $0x28] sm:$0xff]  ;;  %v1450_v18 = vld [vmem:[%s2247_s3 + $0x30] sm:$0xff] }
 0x2da   : > { %1453 = vmatmul.msk.f32.gmra.mxu3 %vm600_vm12, %v1449_v5 }
 0x2db   : > { %v824_v54 = vsel %vm816_vm9, %v810_v17, %v820_v19  ;;  %1649 = vrot.lane.b32.xlu2 %v1648_v20, %s1692_s25  ;;  %v1451_v19 = vld [vmem:[%s2247_s3 + $0x38] sm:$0xff] }
 0x2dc   : > { %v2055_v21 = vadd.f32 %v824_v54, %v1945_v3  ;;  %v1543_v3 = vld [vmem:[%s2246_s2 + $0x20] sm:$0xff] }
 0x2de   : > { %906 = vmatpush.msrb.mxu0 %v2055_v21  ;;  %1548 = vmatpush.msrb.mxu1 %v2055_v21  ;;  %v1653_v26 = vpack.i.bf16 %v2055_v21, %v2043_v14  ;;  %v928_v28 = vrot.slane %v2055_v21, 5  ;;  %v945_v48 = vrot.slane %v2055_v21, 3 }
 0x2e0   : > { %1654 = vrot.lane.b32.xlu0 %v1653_v26, %s1694_s14  ;;  %907 = vmatpush.msrb.mxu0 %v2043_v14  ;;  %v933_v30 = vsel %vm929_vm10, %v928_v28, %v925_v25  ;;  %v950_v50 = vsel %vm946_vm8, %v945_v48, %v942_v16  ;;  %v947_v51 = vsel %vm946_vm8, %v944_v13, %v945_v48 }
 0x2e1   : > { %1549 = vmatpush.msrb.mxu1 %v2043_v14  ;;  %v934_v33 = vsel %vm921_vm11, %v933_v30, %v863_v29  ;;  %v930_v9 = vsel %vm929_vm10, %v927_v63, %v928_v28 }
 0x2e2   : > { %1462 = vmatmul.msk.f32.vlgmr.msrb.gmra.mxu1 %vm600_vm12, %v1458_v22  ;;  %v987_v41 = vsel %vm600_vm12, %v934_v33, %v1646_v34  ;;  %1454 = vmatmul.msk.f32.gmra.mxu3 %vm600_vm12, %v1450_v18  ;;  %v1493_v33 = vld [vmem:[%s2248_s4 + $0x48] sm:$0xff]  ;;  %v1494_v34 = vld [vmem:[%s2248_s4 + $0x50] sm:$0xff] }
 0x2e3   : > { %1033 = vmatpush.bf16.msra.mxu1 %v1544_v23  ;;  %1265 = vmatpush.bf16.msra.mxu0 %v1547_v37 }
 0x2e7   : > { %1034 = vmatpush.bf16.msra.mxu1 %v1543_v3 }
 0x2ea   : > { %1463 = vmatmul.msk.f32.gmra.mxu1 %vm600_vm12, %v1459_v24  ;;  %1455 = vmatmul.msk.f32.gmra.mxu3 %vm600_vm12, %v1451_v19  ;;  %v1456_v24 = vld [vmem:[%s2248_s4 + $0x20] sm:$0xff] }
 0x2eb   : > { %1035 = vmatpush.bf16.msra.mxu1 %v1542_v27  ;;  %1460 = vmatmul.msk.f32.vlgmr.msrb.gmra.mxu0 %vm600_vm12, %v1456_v24 }
 0x335   : > { %v1650_v36 = vpop.permute.xlu2 %1649 }
 0x336   : > { %v1652_v38 = vunpack.i.h.bf16 %v1650_v36  ;;  %v1651_v39 = vunpack.i.l.bf16 %v1650_v36  ;;  %v1495_v36 = vld [vmem:[%s2248_s4 + $0x58] sm:$0xff] }
 0x338   : > { %v992_v42 = vsel %vm382_vm6, %v988_v40, %v1652_v38  ;;  %v991_v43 = vsel %vm382_vm6, %v987_v41, %v1651_v39  ;;  %v1457_v39 = vld [vmem:[%s2248_s4 + $0x28] sm:$0xff]  ;;  %v1546_v40 = vld [vmem:[%s2246_s2 + $0x38] sm:$0xff] }
 0x339   : > { %v995_v44 = vpack.c.bf16 %v992_v42, %v991_v43  ;;  %1461 = vmatmul.msk.f32.gmra.mxu0 %vm600_vm12, %v1457_v39  ;;  %v1545_v42 = vld [vmem:[%s2246_s2 + $0x30] sm:$0xff] }
 0x33a   : > { %1266 = vmatpush.bf16.msra.mxu0 %v1546_v40 }
 0x33b   : > { %1482 = vmatmul.msk.bf16.vlgmr.msra.gmra.mxu1 %vm787_vm2, %v995_v44 }
 0x33e   : > { %1267 = vmatpush.bf16.msra.mxu0 %v1545_v42 }
 0x35d   : > { %v866_v38 = vpop.f32.mrf.mxu3 }
 0x35f   : > { %v915_v47 = vpop.f32.mrf.mxu1 }
 0x360   : > { %v593_v47 = vadd.s32 8, %v1928_v1 }
 0x362   : > { %vm1156_vm5 = vcmp.ge.s32.totalorder %v593_v47, 9 }
 0x365   : > { %v869_v41 = vpop.f32.mrf.mxu3 }
 0x367   : > { %v918_v49 = vpop.f32.mrf.mxu1 }
 0x368   : > { %v954_v0 = vsel %vm941_vm13, %v950_v50, %v918_v49 }
 0x369   : > { %v1658_v55 = vpack.i.bf16 %v954_v0, %v947_v51 }
 0x36b   : > { %1659 = vrot.lane.b32.xlu1 %v1658_v55, %s1692_s25 }
 0x36d   : > { %v872_v43 = vpop.f32.mrf.mxu3 }
 0x3b8   : > { %v1037_v56 = vpop.f32.mrf.mxu1 }
 0x3b9   : > { %v1051_v57 = vmul.f32 0.01, %v1037_v56  ;;  %vm1047_vm15 = vcmp.gt.f32.partialorder %v1037_v56, 0.0 }
 0x3bb   : > { %v1055_v46 = vsel %vm1047_vm15, %v1037_v56, %v1051_v57 }
 0x3bc   : > { %v2103_v35 = vadd.f32 %v1055_v46, %v2018_v52  ;;  %v1485_v52 = vld [vmem:[%s2247_s3 + $0x48] sm:$0xff] }
 0x3be   : > { %v1159_v49 = vrot.slane %v2103_v35, 7 }
 0x3c0   : > { %v1039_v45 = vpop.f32.mrf.mxu1 }
 0x3c1   : > { %vm1048_vm1 = vcmp.gt.f32.partialorder %v1039_v45, 0.0  ;;  %v1052_v58 = vmul.f32 0.01, %v1039_v45 }
 0x3c3   : > { %v1056_v59 = vsel %vm1048_vm1, %v1039_v45, %v1052_v58 }
 0x3c4   : > { %v2106_v60 = vadd.f32 %v1056_v59, %v2021_v53  ;;  %v1655_v53 = vpop.permute.xlu0 %1654 }
 0x3c5   : > { %v1657_v4 = vunpack.i.h.bf16 %v1655_v53  ;;  %v1656_v6 = vunpack.i.l.bf16 %v1655_v53 }
 0x3c6   : > { %1094 = vmatpush.msra.mxu2 %v2106_v60  ;;  %v1663_v61 = vpack.i.bf16 %v2106_v60, %v2103_v35  ;;  %v1176_v29 = vrot.slane %v2106_v60, 1  ;;  %v1160_v18 = vrot.slane %v2106_v60, 7 }
 0x3c7   : > { %v989_v12 = vsel %vm600_vm12, %v931_v8, %v1656_v6  ;;  %v990_v15 = vsel %vm600_vm12, %v930_v9, %v1657_v4  ;;  %v594_v8 = vadd.s32 16, %v1928_v1  ;;  %v1175_v9 = vrot.slane %v2103_v35, 1 }
 0x3c8   : > { %1664 = vrot.lane.b32.xlu2 %v1663_v61, %s1694_s14  ;;  %1095 = vmatpush.msra.mxu2 %v2103_v35 }
 0x3c9   : > { %1488 = vmatmul.msk.f32.vlgmr.msra.gmra.mxu2 %vm600_vm12, %v1484_v62  ;;  %v909_v62 = vpop.f32.mrf.mxu0  ;;  %vm1173_vm7 = vcmp.lt.s32.totalorder %v594_v8, 23 }
 0x3d1   : > { %1489 = vmatmul.msk.f32.gmra.mxu2 %vm600_vm12, %v1485_v52 }
 0x3dd   : > { %v1660_v7 = vpop.permute.xlu1 %1659 }
 0x3de   : > { %v1662_v10 = vunpack.i.h.bf16 %v1660_v7  ;;  %v1661_v11 = vunpack.i.l.bf16 %v1660_v7 }
 0x3e0   : > { %v993_v16 = vsel %vm382_vm6, %v989_v12, %v1661_v11  ;;  %v994_v13 = vsel %vm382_vm6, %v990_v15, %v1662_v10 }
 0x3e1   : > { %v996_v17 = vpack.c.bf16 %v994_v13, %v993_v16  ;;  %v912_v16 = vpop.f32.mrf.mxu0  ;;  %v1486_v13 = vld [vmem:[%s2247_s3 + $0x50] sm:$0xff] }
 0x3e2   : > { %1490 = vmatmul.msk.f32.gmra.mxu2 %vm600_vm12, %v1486_v13 }
 0x3e3   : > { %1483 = vmatmul.msk.bf16.gmra.mxu1 %vm787_vm2, %v996_v17  ;;  %v1487_v17 = vld [vmem:[%s2247_s3 + $0x58] sm:$0xff] }
 0x3ea   : > { %1491 = vmatmul.msk.f32.gmra.mxu2 %vm600_vm12, %v1487_v17 }
 0x422   : > { %v1665_v0 = vpop.permute.xlu2 %1664 }
 0x423   : > { %v1667_v56 = vunpack.i.h.bf16 %v1665_v0  ;;  %v1666_v57 = vunpack.i.l.bf16 %v1665_v0 }
 0x44c   : > { %v1097_v44 = vpop.f32.mrf.mxu2 }
 0x44d   : > { %v1219_v59 = vsel %vm600_vm12, %v1097_v44, %v1666_v57 }
 0x454   : > { %v1100_v50 = vpop.f32.mrf.mxu2 }
 0x460   : > { %v1042_v20 = vpop.f32.mrf.mxu1 }
 0x461   : > { %v1053_v54 = vmul.f32 0.01, %v1042_v20  ;;  %vm1049_vm3 = vcmp.gt.f32.partialorder %v1042_v20, 0.0 }
 0x463   : > { %v1057_v26 = vsel %vm1049_vm3, %v1042_v20, %v1053_v54 }
 0x464   : > { %v2144_v22 = vadd.f32 %v1057_v26, %v2043_v14 }
 0x465   : > { %v1103_v38 = vpop.f32.mrf.mxu2 }
 0x466   : > { %v1177_v25 = vrot.slane %v2144_v22, 1  ;;  %v1161_v19 = vrot.slane %v2144_v22, 7 }
 0x468   : > { %v1044_v23 = vpop.f32.mrf.mxu1  ;;  %v1180_v31 = vsel %vm712_vm14, %v1176_v29, %v1177_v25  ;;  %v1164_v24 = vsel %vm695_vm0, %v1160_v18, %v1161_v19 }
 0x469   : > { %vm1050_vm4 = vcmp.gt.f32.partialorder %v1044_v23, 0.0  ;;  %v1054_v3 = vmul.f32 0.01, %v1044_v23 }
 0x46b   : > { %v1058_v27 = vsel %vm1050_vm4, %v1044_v23, %v1054_v3 }
 0x46c   : > { %v2151_v28 = vadd.f32 %v1058_v27, %v2055_v21  ;;  %v1165_v27 = vsel %vm695_vm0, %v1159_v49, %v1160_v18 }
 0x46d   : > { %v1106_v39 = vpop.f32.mrf.mxu2 }
 0x46e   : > { %1140 = vmatpush.msra.mxu3 %v2151_v28  ;;  %v1673_v14 = vpack.i.bf16 %v2151_v28, %v2144_v22  ;;  %v1178_v30 = vrot.slane %v2151_v28, 1  ;;  %v1162_v48 = vrot.slane %v2151_v28, 7 }
 0x470   : > { %1674 = vrot.lane.b32.xlu1 %v1673_v14, %s1694_s14  ;;  %1141 = vmatpush.msra.mxu3 %v2144_v22  ;;  %v1179_v21 = vsel %vm712_vm14, %v1177_v25, %v1178_v30  ;;  %v1166_v51 = vsel %vm695_vm0, %v1162_v48, %v1159_v49  ;;  %v1182_v10 = vsel %vm712_vm14, %v1178_v30, %v1175_v9 }
 0x471   : > { %1496 = vmatmul.msk.f32.vlgmr.msra.gmra.mxu3 %vm600_vm12, %v1492_v2  ;;  %v1668_v32 = vpack.i.bf16 %v1179_v21, %v1180_v31  ;;  %v1168_v55 = vsel %vm1156_vm5, %v1166_v51, %v1100_v50 }
 0x472   : > { %v1220_v61 = vsel %vm600_vm12, %v1168_v55, %v1667_v56 }
 0x473   : > { %1669 = vrot.lane.b32.xlu0 %v1668_v32, %s1692_s25 }
 0x479   : > { %1497 = vmatmul.msk.f32.gmra.mxu3 %vm600_vm12, %v1493_v33 }
 0x481   : > { %1498 = vmatmul.msk.f32.gmra.mxu3 %vm600_vm12, %v1494_v34 }
 0x489   : > { %1499 = vmatmul.msk.f32.gmra.mxu3 %vm600_vm12, %v1495_v36 }
 0x4e2   : > { %v1675_v5 = vpop.permute.xlu1 %1674 }
 0x4e3   : > { %v1677_v20 = vunpack.i.h.bf16 %v1675_v5  ;;  %v1676_v54 = vunpack.i.l.bf16 %v1675_v5 }
 0x4e5   : > { %v1670_v45 = vpop.permute.xlu0 %1669  ;;  %v1222_v2 = vsel %vm600_vm12, %v1164_v24, %v1677_v20  ;;  %v1221_v29 = vsel %vm600_vm12, %v1165_v27, %v1676_v54 }
 0x4e6   : > { %v1672_v46 = vunpack.i.h.bf16 %v1670_v45  ;;  %v1671_v58 = vunpack.i.l.bf16 %v1670_v45 }
 0x4e8   : > { %v1223_v52 = vsel %vm382_vm6, %v1219_v59, %v1671_v58  ;;  %v1224_v53 = vsel %vm382_vm6, %v1220_v61, %v1672_v46 }
 0x4e9   : > { %v1227_v63 = vpack.c.bf16 %v1224_v53, %v1223_v52 }
 0x4eb   : > { %1518 = vmatmul.msk.bf16.vlgmr.msra.gmra.mxu0 %vm787_vm2, %v1227_v63 }
 0x4f4   : > { %v1143_v4 = vpop.f32.mrf.mxu3 }
 0x4fc   : > { %v1146_v6 = vpop.f32.mrf.mxu3 }
 0x504   : > { %v1149_v7 = vpop.f32.mrf.mxu3 }
 0x505   : > { %v1185_v12 = vsel %vm1173_vm7, %v1182_v10, %v1149_v7 }
 0x50c   : > { %v1152_v11 = vpop.f32.mrf.mxu3 }
 0x50d   : > { %v1678_v15 = vpack.i.bf16 %v1152_v11, %v1185_v12 }
 0x50f   : > { %1679 = vrot.lane.b32.xlu2 %v1678_v15, %s1692_s25  ;;  %s1522_s25 = sshll.u32 %s2251_s19, 5 }
 0x510   : > { %s224_s19 = scalar_lea.vmem %s2249_s5, %s1522_s25 }
 0x568   : > { %v1269_v26 = vpop.f32.mrf.mxu0 }
 0x569   : > { %vm1279_vm14 = vcmp.gt.f32.partialorder %v1269_v26, 0.0  ;;  %v1283_v23 = vmul.f32 0.01, %v1269_v26  ;;  %v1680_v3 = vpop.permute.xlu2 %1679 }
 0x56a   : > { %v1682_v25 = vunpack.i.h.bf16 %v1680_v3  ;;  %v1681_v14 = vunpack.i.l.bf16 %v1680_v3 }
 0x56b   : > { %v1287_v30 = vsel %vm1279_vm14, %v1269_v26, %v1283_v23 }
 0x56c   : > { %v1291_v21 = vadd.f32 %v1287_v30, %v2103_v35  ;;  %v1225_v31 = vsel %vm382_vm6, %v1221_v29, %v1681_v14  ;;  %v1226_v32 = vsel %vm382_vm6, %v1222_v2, %v1682_v25 }
 0x56d   : > { %v1228_v33 = vpack.c.bf16 %v1226_v32, %v1225_v31 }
 0x56e   : > { %1295 = vst.msk [vmem:[%s224_s19] sm:$0xff] %vm600_vm12, %v1291_v21 }
 0x56f   : > { %1519 = vmatmul.msk.bf16.gmra.mxu0 %vm787_vm2, %v1228_v33 }
 0x570   : > { %v1271_v1 = vpop.f32.mrf.mxu0 }
 0x571   : > { %vm1280_vm0 = vcmp.gt.f32.partialorder %v1271_v1, 0.0  ;;  %v1284_v34 = vmul.f32 0.01, %v1271_v1 }
 0x573   : > { %v1288_v36 = vsel %vm1280_vm0, %v1271_v1, %v1284_v34 }
 0x574   : > { %v1292_v37 = vadd.f32 %v1288_v36, %v2106_v60 }
 0x576   : > { %1296 = vst.msk [vmem:[%s224_s19 + $0x8] sm:$0xff] %vm600_vm12, %v1292_v37 }
 0x5ec   : > { %v1274_v35 = vpop.f32.mrf.mxu0 }
 0x5ed   : > { %vm1281_vm8 = vcmp.gt.f32.partialorder %v1274_v35, 0.0  ;;  %v1285_v40 = vmul.f32 0.01, %v1274_v35 }
 0x5ef   : > { %v1289_v41 = vsel %vm1281_vm8, %v1274_v35, %v1285_v40 }
 0x5f0   : > { %v1293_v42 = vadd.f32 %v1289_v41, %v2144_v22 }
 0x5f2   : > { %1297 = vst.msk [vmem:[%s224_s19 + $0x10] sm:$0xff] %vm600_vm12, %v1293_v42 }
 0x5f4   : > { %v1276_v43 = vpop.f32.mrf.mxu0 }
 0x5f5   : > { %vm1282_vm6 = vcmp.gt.f32.partialorder %v1276_v43, 0.0  ;;  %v1286_v44 = vmul.f32 0.01, %v1276_v43 }
 0x5f7   : > { %v1290_v47 = vsel %vm1282_vm6, %v1276_v43, %v1286_v44 }
 0x5f8   : > { %v1294_v48 = vadd.f32 %v1290_v47, %v2151_v28 }
 0x5fa   : > { %1298 = vst.msk [vmem:[%s224_s19 + $0x18] sm:$0xff] %vm600_vm12, %v1294_v48 }
 0x5fb PF: > { %s15_s18 = sadd.s32 1, %s1689_s18  }
 0x5fc   : > { %p12_p4 = scmp.ge.s32.totalorder %s15_s18, 4  }
 0x5fe   :  { %14 = sbr.rel (!%p12_p4) target bundleno = 1 (0x1), region = 76 }

</bundles_post_ra>
